<compile_context>
chip_gen: v7x
topology: tpu7x:2x2x1
jax: 0.10.0
libtpu: 0.0.40
codegen_flags: <defaults>
</compile_context>

<pallas_src>
import functools

import jax
import jax.numpy as jnp
from jax.experimental import pallas as pl
from jax.experimental.pallas import tpu as pltpu

WIN = 7            # skimage default win_size (gaussian_weights=False)
PAD = WIN - 1      # 6-row / 6-col halo of the "valid" window region
K1 = 0.01
K2 = 0.03


class ShapeMismatchException(Exception):
    pass


def _round_up(v, m):
    return (v + m - 1) // m * m


def _ssim_kernel(dr_ref, x_ref, y_ref, o_ref, comb_ref, *, H, W):
    """One (batch b, channel c, row-tile t) grid step.

    dr_ref   : SMEM (B,)              per-batch data_range (hoisted to wrapper)
    x_ref    : VMEM (To, W_pad)       row tile of x[b, c]       (W_pad = ow_pad+6)
    y_ref    : VMEM (To, W_pad)       row tile of target[b, c]
    o_ref    : VMEM (8, ow_pad)       per-(b, c) lane-wide partial-sum accumulator
    comb_ref : VMEM (5, To+8, ow_pad) horizontal 7-tap sums of x, y, xx, yy, xy;
               rows [2,8) carry the 6-row halo of the previous tile, rows
               [8,To+8) the current tile, rows [0,2) are never read.
    """
    b = pl.program_id(0)
    t = pl.program_id(2)

    To, W_pad = x_ref.shape
    ow_pad = comb_ref.shape[-1]
    oh = H - WIN + 1
    ow = W - WIN + 1
    NP = float(WIN * WIN)                 # 49
    cov_norm = NP / (NP - 1.0)            # sample covariance (skimage default)
    inv_np = 1.0 / NP

    dr = dr_ref[b]
    c1 = (K1 * dr) * (K1 * dr)
    c2 = (K2 * dr) * (K2 * dr)

    # ---- vertical halo: carry last 6 rows of the previous tile's horizontal
    #      sums.  At t == 0 these rows are stale, but they only ever feed
    #      output rows r < 0, which the validity mask removes (no zero-init).
    @pl.when(t > 0)
    def _():
        comb_ref[:, 2:8, :] = comb_ref[:, To + 2:To + 8, :]

    # ---- horizontal 7-tap sums: lane-shifted *ref* loads of x and y, with
    #      the xx / yy / xy products formed in registers (no staging scratch).
    xs = x_ref[:, 0:ow_pad]
    ys = y_ref[:, 0:ow_pad]
    sx, sy = xs, ys
    sxx, syy, sxy = xs * xs, ys * ys, xs * ys
    for dj in range(1, WIN):
        xs = x_ref[:, dj:dj + ow_pad]
        ys = y_ref[:, dj:dj + ow_pad]
        sx = sx + xs
        sy = sy + ys
        sxx = sxx + xs * xs
        syy = syy + ys * ys
        sxy = sxy + xs * ys
    comb_ref[0, 8:To + 8, :] = sx         # lane-dense (ow_pad % 128 == 0) stores
    comb_ref[1, 8:To + 8, :] = sy
    comb_ref[2, 8:To + 8, :] = sxx
    comb_ref[3, 8:To + 8, :] = syy
    comb_ref[4, 8:To + 8, :] = sxy

    # ---- vertical 7-tap sums over halo + current rows
    w = comb_ref[:, 2:2 + To, :]
    for di in range(1, WIN):
        w = w + comb_ref[:, 2 + di:2 + di + To, :]
    # w: (5, To, ow_pad) windowed sums of x, y, x², y², x·y

    ux = w[0] * inv_np
    uy = w[1] * inv_np
    uxux = ux * ux
    uyuy = uy * uy
    uxuy = ux * uy
    vxx = cov_norm * (w[2] * inv_np - uxux)
    vyy = cov_norm * (w[3] * inv_np - uyuy)
    vxy = cov_norm * (w[4] * inv_np - uxuy)

    a1 = 2.0 * uxuy + c1
    a2 = 2.0 * vxy + c2
    b1 = uxux + uyuy + c1
    b2 = vxx + vyy + c2
    s = (a1 * a2) / (b1 * b2)             # (To, ow_pad) SSIM map of this tile

    # Output row j of this tile is absolute row t*To - 6 + j.  Mask rows that
    # fall outside [0, oh) (first-tile halo, zero-padded bottom rows) and the
    # zero-padded lane columns >= ow BEFORE any accumulation.
    r = jax.lax.broadcasted_iota(jnp.int32, (To, ow_pad), 0) + (t * To - PAD)
    col = jax.lax.broadcasted_iota(jnp.int32, (To, ow_pad), 1)
    valid = (r >= 0) & (r < oh) & (col < ow)
    masked = jnp.where(valid, s, 0.0)

    # Fold sublane groups into the lane-wide (8, ow_pad) accumulator; the
    # single cross-lane reduction is deferred to the wrapper (XLA).
    partial = masked[0:8, :]
    for g in range(1, To // 8):
        partial = partial + masked[g * 8:(g + 1) * 8, :]

    @pl.when(t == 0)
    def _():
        o_ref[...] = jnp.zeros_like(o_ref)

    o_ref[...] += partial


def _choose_row_tile(H, W_pad, ow_pad, row_tile):
    """Largest row tile (multiple of 8) fitting a per-generation-safe VMEM budget."""
    if row_tile is not None:
        to_max = max(8, (int(row_tile) // 8) * 8)
    else:
        budget = 8 * 1024 * 1024                  # scratch/buffers/temps target
        # x,y double-buffered blocks + 5-plane comb + elementwise temporaries
        per_row = 16 * W_pad + 88 * ow_pad        # bytes per tile row (estimate)
        to_max = max(8, min(512, (budget // per_row) // 8 * 8))
    T = -(-H // to_max)
    To = _round_up(-(-H // T), 8)
    return int(To), int(T)


def _ssim_pallas(x, target, dr, row_tile=None):
    B, C, H, W = x.shape
    oh = H - WIN + 1
    ow = W - WIN + 1
    ow_pad = _round_up(ow, 128)          # lane-dense valid-window width
    W_pad = ow_pad + WIN - 1             # input width needed for ow_pad windows

    To, T = _choose_row_tile(H, W_pad, ow_pad, row_tile)
    H_pad = To * T

    # Zero-pad rows/cols so every lane dimension the kernel touches is a
    # multiple of 128 and the last row tile has no grid-padding garbage.
    # Padded rows/cols only reach masked output positions.
    if H_pad != H or W_pad != W:
        pads = ((0, 0), (0, 0), (0, H_pad - H), (0, W_pad - W))
        x = jnp.pad(x, pads)
        target = jnp.pad(target, pads)

    kernel = functools.partial(_ssim_kernel, H=H, W=W)

    out = pl.pallas_call(
        kernel,
        out_shape=jax.ShapeDtypeStruct((B, C, 8, ow_pad), jnp.float32),
        grid=(B, C, T),
        in_specs=[
            pl.BlockSpec(memory_space=pltpu.MemorySpace.SMEM),               # dr (B,)
            pl.BlockSpec((None, None, To, W_pad), lambda b, c, t: (b, c, t, 0)),
            pl.BlockSpec((None, None, To, W_pad), lambda b, c, t: (b, c, t, 0)),
        ],
        out_specs=pl.BlockSpec((None, None, 8, ow_pad),
                               lambda b, c, t: (b, c, 0, 0)),
        scratch_shapes=[
            pltpu.VMEM((5, To + 8, ow_pad), jnp.float32),   # horiz sums + 6-row halo
        ],
        compiler_params=pltpu.CompilerParams(
            dimension_semantics=("parallel", "parallel", "arbitrary"),
            vmem_limit_bytes=32 * 1024 * 1024),
    )(dr, x, target)

    # Final tiny reductions in XLA: per-channel SSIM mean, then channel mean.
    per_channel = jnp.sum(out, axis=(2, 3)) / float(oh * ow)   # (B, C)
    return jnp.mean(per_channel, axis=1)                        # (B,)


def ssim(x, target, reduce=None, row_tile=None):
    """Batched SSIM. x, target: (B, C, H, W) float32. Returns (B,) or scalar."""
    if x.shape != target.shape:
        raise ShapeMismatchException(
            f"x (shape {x.shape}) and target (shape {target.shape}) tensors "
            f"must match to compare with SSIM")
    x = x.astype(jnp.float32)
    target = target.astype(jnp.float32)
    B, C, H, W = x.shape
    if H < WIN or W < WIN:
        raise ValueError("win_size exceeds image extent")

    # data_range per batch element: cheap XLA sweep, hoisted out of the kernel
    # (computed on the *unpadded* target).
    dr = (jnp.max(target, axis=(1, 2, 3)) -
          jnp.min(target, axis=(1, 2, 3))).astype(jnp.float32)

    vals = _ssim_pallas(x, target, dr, row_tile)

    if reduce is None:
        return vals
    elif reduce == "mean":
        return jnp.mean(vals)
    else:
        raise ValueError(
            f"expected one of 'mean' or None for parameter 'reduce', got {reduce}")


def _ssim_reference(x, target):
    """Pure-JAX (XLA) reference with identical semantics, for validation."""
    x = x.astype(jnp.float32)
    y = target.astype(jnp.float32)
    B, C, H, W = x.shape
    oh, ow = H - WIN + 1, W - WIN + 1

    def wsum(a):
        h = a[..., 0:ow]
        for dj in range(1, WIN):
            h = h + a[..., dj:dj + ow]
        v = h[..., 0:oh, :]
        for di in range(1, WIN):
            v = v + h[..., di:di + oh, :]
        return v

    NP = float(WIN * WIN)
    cov_norm = NP / (NP - 1.0)
    dr = jnp.max(y, axis=(1, 2, 3)) - jnp.min(y, axis=(1, 2, 3))
    c1 = ((K1 * dr) ** 2)[:, None, None, None]
    c2 = ((K2 * dr) ** 2)[:, None, None, None]

    ux, uy = wsum(x) / NP, wsum(y) / NP
    uxx, uyy, uxy = wsum(x * x) / NP, wsum(y * y) / NP, wsum(x * y) / NP
    vx = cov_norm * (uxx - ux * ux)
    vy = cov_norm * (uyy - uy * uy)
    vxy = cov_norm * (uxy - ux * uy)
    s = ((2 * ux * uy + c1) * (2 * vxy + c2)) / \
        ((ux * ux + uy * uy + c1) * (vx + vy + c2))
    return jnp.mean(s, axis=(1, 2, 3))


if __name__ == "__main__":
    key = jax.random.PRNGKey(0)
    kx, kt = jax.random.split(key)
    B, C, H, W = 2, 4, 16, 16
    x = jax.random.uniform(kx, (B, C, H, W), dtype=jnp.float32)
    target = jax.random.uniform(kt, (B, C, H, W), dtype=jnp.float32)

    ref = jax.block_until_ready(_ssim_reference(x, target))

    # multi-row-tile path (exercises halo carry + revisited accumulator)
    vals = jax.block_until_ready(ssim(x, target, row_tile=8))
    assert vals.shape == (B,) and vals.dtype == jnp.float32
    assert float(jnp.max(jnp.abs(vals - ref))) < 1e-4, (vals, ref)

    # single-tile path + mean reduction
    mean_val = jax.block_until_ready(ssim(x, target, reduce="mean"))
    assert mean_val.shape == ()
    assert abs(float(mean_val) - float(jnp.mean(ref))) < 1e-4

    # sanity: SSIM(x, x) == 1
    self_vals = jax.block_until_ready(ssim(x, x, row_tile=8))
    assert bool(jnp.all(jnp.abs(self_vals - 1.0) < 1e-3)), self_vals

    # ragged shapes: padded bottom rows + padded lane columns (mask path)
    B2, C2, H2, W2 = 2, 3, 20, 18
    x2 = jax.random.uniform(jax.random.PRNGKey(1), (B2, C2, H2, W2),
                            dtype=jnp.float32)
    t2 = jax.random.uniform(jax.random.PRNGKey(2), (B2, C2, H2, W2),
                            dtype=jnp.float32)
    v2 = jax.block_until_ready(ssim(x2, t2, row_tile=8))
    r2 = jax.block_until_ready(_ssim_reference(x2, t2))
    assert float(jnp.max(jnp.abs(v2 - r2))) < 1e-4, (v2, r2)

    print("KERNEL_OK")
</pallas_src>

<mosaic_0001>
module attributes {stable_mosaic.version = 11 : i64} {
  func.func @_ssim_kernel(%arg0: i32, %arg1: i32, %arg2: i32, %arg3: memref<2xf32, #tpu.memory_space<smem>>, %arg4: memref<1x1x8x134xf32, #tpu.memory_space<vmem>>, %arg5: memref<1x1x8x134xf32, #tpu.memory_space<vmem>>, %arg6: memref<1x1x8x128xf32, #tpu.memory_space<vmem>>, %arg7: memref<5x16x128xf32, #tpu.memory_space<vmem>>) attributes {dimension_semantics = [#tpu.dimension_semantics<parallel>, #tpu.dimension_semantics<parallel>, #tpu.dimension_semantics<arbitrary>], iteration_bounds = array<i64: 2, 4, 2>, scalar_prefetch = 0 : i64, scratch_operands = 1 : i64, tpu.core_type = #tpu.core_type<tc>, window_params = [{transform_indices = @transform_0, window_bounds = array<i64: 2>}, {transform_indices = @transform_1, window_bounds = array<i64: 1, 1, 8, 134>}, {transform_indices = @transform_2, window_bounds = array<i64: 1, 1, 8, 134>}, {transform_indices = @transform_3, window_bounds = array<i64: 1, 1, 8, 128>}]} {
    %0 = arith.index_cast %arg0 : i32 to index
    %1 = memref.load %arg3[%0] : memref<2xf32, #tpu.memory_space<smem>>
    %cst = arith.constant 0.00999999977 : f32
    %2 = arith.mulf %cst, %1 : f32
    %cst_0 = arith.constant 0.00999999977 : f32
    %3 = arith.mulf %cst_0, %1 : f32
    %4 = arith.mulf %2, %3 : f32
    %cst_1 = arith.constant 3.000000e-02 : f32
    %5 = arith.mulf %cst_1, %1 : f32
    %cst_2 = arith.constant 3.000000e-02 : f32
    %6 = arith.mulf %cst_2, %1 : f32
    %7 = arith.mulf %5, %6 : f32
    %c0_i32 = arith.constant 0 : i32
    %8 = arith.cmpi sgt, %arg2, %c0_i32 : i32
    %9 = arith.extui %8 : i1 to i32
    %c0_i32_3 = arith.constant 0 : i32
    %10 = arith.cmpi ne, %9, %c0_i32_3 : i32
    scf.if %10 {
      %c0_110 = arith.constant 0 : index
      %c10 = arith.constant 10 : index
      %c0_111 = arith.constant 0 : index
      %192 = vector.load %arg7[%c0_110, %c10, %c0_111] : memref<5x16x128xf32, #tpu.memory_space<vmem>>, vector<5x6x128xf32>
      %c0_112 = arith.constant 0 : index
      %c2_113 = arith.constant 2 : index
      %c0_114 = arith.constant 0 : index
      %193 = vector.load %arg7[%c0_112, %c2_113, %c0_114] : memref<5x16x128xf32, #tpu.memory_space<vmem>>, vector<5x6x128xf32>
      tpu.vector_store %arg7[%c0_112, %c2_113, %c0_114], %192 {strides = array<i32>} : memref<5x16x128xf32, #tpu.memory_space<vmem>>, vector<5x6x128xf32>,
    } else {
    }
    %c0 = arith.constant 0 : index
    %c0_4 = arith.constant 0 : index
    %c0_5 = arith.constant 0 : index
    %c0_6 = arith.constant 0 : index
    %11 = vector.load %arg4[%c0, %c0_4, %c0_5, %c0_6] : memref<1x1x8x134xf32, #tpu.memory_space<vmem>>, vector<1x1x8x128xf32>
    %12 = vector.shape_cast %11 : vector<1x1x8x128xf32> to vector<8x128xf32>
    %c0_7 = arith.constant 0 : index
    %c0_8 = arith.constant 0 : index
    %c0_9 = arith.constant 0 : index
    %c0_10 = arith.constant 0 : index
    %13 = vector.load %arg5[%c0_7, %c0_8, %c0_9, %c0_10] : memref<1x1x8x134xf32, #tpu.memory_space<vmem>>, vector<1x1x8x128xf32>
    %14 = vector.shape_cast %13 : vector<1x1x8x128xf32> to vector<8x128xf32>
    %15 = arith.mulf %12, %12 : vector<8x128xf32>
    %16 = arith.mulf %14, %14 : vector<8x128xf32>
    %17 = arith.mulf %12, %14 : vector<8x128xf32>
    %c0_11 = arith.constant 0 : index
    %c0_12 = arith.constant 0 : index
    %c0_13 = arith.constant 0 : index
    %c1 = arith.constant 1 : index
    %18 = vector.load %arg4[%c0_11, %c0_12, %c0_13, %c1] : memref<1x1x8x134xf32, #tpu.memory_space<vmem>>, vector<1x1x8x128xf32>
    %19 = vector.shape_cast %18 : vector<1x1x8x128xf32> to vector<8x128xf32>
    %c0_14 = arith.constant 0 : index
    %c0_15 = arith.constant 0 : index
    %c0_16 = arith.constant 0 : index
    %c1_17 = arith.constant 1 : index
    %20 = vector.load %arg5[%c0_14, %c0_15, %c0_16, %c1_17] : memref<1x1x8x134xf32, #tpu.memory_space<vmem>>, vector<1x1x8x128xf32>
    %21 = vector.shape_cast %20 : vector<1x1x8x128xf32> to vector<8x128xf32>
    %22 = arith.addf %12, %19 : vector<8x128xf32>
    %23 = arith.addf %14, %21 : vector<8x128xf32>
    %24 = arith.mulf %19, %19 : vector<8x128xf32>
    %25 = arith.addf %15, %24 : vector<8x128xf32>
    %26 = arith.mulf %21, %21 : vector<8x128xf32>
    %27 = arith.addf %16, %26 : vector<8x128xf32>
    %28 = arith.mulf %19, %21 : vector<8x128xf32>
    %29 = arith.addf %17, %28 : vector<8x128xf32>
    %c0_18 = arith.constant 0 : index
    %c0_19 = arith.constant 0 : index
    %c0_20 = arith.constant 0 : index
    %c2 = arith.constant 2 : index
    %30 = vector.load %arg4[%c0_18, %c0_19, %c0_20, %c2] : memref<1x1x8x134xf32, #tpu.memory_space<vmem>>, vector<1x1x8x128xf32>
    %31 = vector.shape_cast %30 : vector<1x1x8x128xf32> to vector<8x128xf32>
    %c0_21 = arith.constant 0 : index
    %c0_22 = arith.constant 0 : index
    %c0_23 = arith.constant 0 : index
    %c2_24 = arith.constant 2 : index
    %32 = vector.load %arg5[%c0_21, %c0_22, %c0_23, %c2_24] : memref<1x1x8x134xf32, #tpu.memory_space<vmem>>, vector<1x1x8x128xf32>
    %33 = vector.shape_cast %32 : vector<1x1x8x128xf32> to vector<8x128xf32>
    %34 = arith.addf %22, %31 : vector<8x128xf32>
    %35 = arith.addf %23, %33 : vector<8x128xf32>
    %36 = arith.mulf %31, %31 : vector<8x128xf32>
    %37 = arith.addf %25, %36 : vector<8x128xf32>
    %38 = arith.mulf %33, %33 : vector<8x128xf32>
    %39 = arith.addf %27, %38 : vector<8x128xf32>
    %40 = arith.mulf %31, %33 : vector<8x128xf32>
    %41 = arith.addf %29, %40 : vector<8x128xf32>
    %c0_25 = arith.constant 0 : index
    %c0_26 = arith.constant 0 : index
    %c0_27 = arith.constant 0 : index
    %c3 = arith.constant 3 : index
    %42 = vector.load %arg4[%c0_25, %c0_26, %c0_27, %c3] : memref<1x1x8x134xf32, #tpu.memory_space<vmem>>, vector<1x1x8x128xf32>
    %43 = vector.shape_cast %42 : vector<1x1x8x128xf32> to vector<8x128xf32>
    %c0_28 = arith.constant 0 : index
    %c0_29 = arith.constant 0 : index
    %c0_30 = arith.constant 0 : index
    %c3_31 = arith.constant 3 : index
    %44 = vector.load %arg5[%c0_28, %c0_29, %c0_30, %c3_31] : memref<1x1x8x134xf32, #tpu.memory_space<vmem>>, vector<1x1x8x128xf32>
    %45 = vector.shape_cast %44 : vector<1x1x8x128xf32> to vector<8x128xf32>
    %46 = arith.addf %34, %43 : vector<8x128xf32>
    %47 = arith.addf %35, %45 : vector<8x128xf32>
    %48 = arith.mulf %43, %43 : vector<8x128xf32>
    %49 = arith.addf %37, %48 : vector<8x128xf32>
    %50 = arith.mulf %45, %45 : vector<8x128xf32>
    %51 = arith.addf %39, %50 : vector<8x128xf32>
    %52 = arith.mulf %43, %45 : vector<8x128xf32>
    %53 = arith.addf %41, %52 : vector<8x128xf32>
    %c0_32 = arith.constant 0 : index
    %c0_33 = arith.constant 0 : index
    %c0_34 = arith.constant 0 : index
    %c4 = arith.constant 4 : index
    %54 = vector.load %arg4[%c0_32, %c0_33, %c0_34, %c4] : memref<1x1x8x134xf32, #tpu.memory_space<vmem>>, vector<1x1x8x128xf32>
    %55 = vector.shape_cast %54 : vector<1x1x8x128xf32> to vector<8x128xf32>
    %c0_35 = arith.constant 0 : index
    %c0_36 = arith.constant 0 : index
    %c0_37 = arith.constant 0 : index
    %c4_38 = arith.constant 4 : index
    %56 = vector.load %arg5[%c0_35, %c0_36, %c0_37, %c4_38] : memref<1x1x8x134xf32, #tpu.memory_space<vmem>>, vector<1x1x8x128xf32>
    %57 = vector.shape_cast %56 : vector<1x1x8x128xf32> to vector<8x128xf32>
    %58 = arith.addf %46, %55 : vector<8x128xf32>
    %59 = arith.addf %47, %57 : vector<8x128xf32>
    %60 = arith.mulf %55, %55 : vector<8x128xf32>
    %61 = arith.addf %49, %60 : vector<8x128xf32>
    %62 = arith.mulf %57, %57 : vector<8x128xf32>
    %63 = arith.addf %51, %62 : vector<8x128xf32>
    %64 = arith.mulf %55, %57 : vector<8x128xf32>
    %65 = arith.addf %53, %64 : vector<8x128xf32>
    %c0_39 = arith.constant 0 : index
    %c0_40 = arith.constant 0 : index
    %c0_41 = arith.constant 0 : index
    %c5 = arith.constant 5 : index
    %66 = vector.load %arg4[%c0_39, %c0_40, %c0_41, %c5] : memref<1x1x8x134xf32, #tpu.memory_space<vmem>>, vector<1x1x8x128xf32>
    %67 = vector.shape_cast %66 : vector<1x1x8x128xf32> to vector<8x128xf32>
    %c0_42 = arith.constant 0 : index
    %c0_43 = arith.constant 0 : index
    %c0_44 = arith.constant 0 : index
    %c5_45 = arith.constant 5 : index
    %68 = vector.load %arg5[%c0_42, %c0_43, %c0_44, %c5_45] : memref<1x1x8x134xf32, #tpu.memory_space<vmem>>, vector<1x1x8x128xf32>
    %69 = vector.shape_cast %68 : vector<1x1x8x128xf32> to vector<8x128xf32>
    %70 = arith.addf %58, %67 : vector<8x128xf32>
    %71 = arith.addf %59, %69 : vector<8x128xf32>
    %72 = arith.mulf %67, %67 : vector<8x128xf32>
    %73 = arith.addf %61, %72 : vector<8x128xf32>
    %74 = arith.mulf %69, %69 : vector<8x128xf32>
    %75 = arith.addf %63, %74 : vector<8x128xf32>
    %76 = arith.mulf %67, %69 : vector<8x128xf32>
    %77 = arith.addf %65, %76 : vector<8x128xf32>
    %c0_46 = arith.constant 0 : index
    %c0_47 = arith.constant 0 : index
    %c0_48 = arith.constant 0 : index
    %c6 = arith.constant 6 : index
    %78 = vector.load %arg4[%c0_46, %c0_47, %c0_48, %c6] : memref<1x1x8x134xf32, #tpu.memory_space<vmem>>, vector<1x1x8x128xf32>
    %79 = vector.shape_cast %78 : vector<1x1x8x128xf32> to vector<8x128xf32>
    %c0_49 = arith.constant 0 : index
    %c0_50 = arith.constant 0 : index
    %c0_51 = arith.constant 0 : index
    %c6_52 = arith.constant 6 : index
    %80 = vector.load %arg5[%c0_49, %c0_50, %c0_51, %c6_52] : memref<1x1x8x134xf32, #tpu.memory_space<vmem>>, vector<1x1x8x128xf32>
    %81 = vector.shape_cast %80 : vector<1x1x8x128xf32> to vector<8x128xf32>
    %82 = arith.addf %70, %79 : vector<8x128xf32>
    %83 = arith.addf %71, %81 : vector<8x128xf32>
    %84 = arith.mulf %79, %79 : vector<8x128xf32>
    %85 = arith.addf %73, %84 : vector<8x128xf32>
    %86 = arith.mulf %81, %81 : vector<8x128xf32>
    %87 = arith.addf %75, %86 : vector<8x128xf32>
    %88 = arith.mulf %79, %81 : vector<8x128xf32>
    %89 = arith.addf %77, %88 : vector<8x128xf32>
    %c0_53 = arith.constant 0 : index
    %c8 = arith.constant 8 : index
    %c0_54 = arith.constant 0 : index
    %90 = vector.load %arg7[%c0_53, %c8, %c0_54] : memref<5x16x128xf32, #tpu.memory_space<vmem>>, vector<1x8x128xf32>
    %91 = vector.shape_cast %90 : vector<1x8x128xf32> to vector<8x128xf32>
    %92 = vector.shape_cast %82 : vector<8x128xf32> to vector<1x8x128xf32>
    tpu.vector_store %arg7[%c0_53, %c8, %c0_54], %92 {strides = array<i32>} : memref<5x16x128xf32, #tpu.memory_space<vmem>>, vector<1x8x128xf32>,
    %c1_55 = arith.constant 1 : index
    %c8_56 = arith.constant 8 : index
    %c0_57 = arith.constant 0 : index
    %93 = vector.load %arg7[%c1_55, %c8_56, %c0_57] : memref<5x16x128xf32, #tpu.memory_space<vmem>>, vector<1x8x128xf32>
    %94 = vector.shape_cast %93 : vector<1x8x128xf32> to vector<8x128xf32>
    %95 = vector.shape_cast %83 : vector<8x128xf32> to vector<1x8x128xf32>
    tpu.vector_store %arg7[%c1_55, %c8_56, %c0_57], %95 {strides = array<i32>} : memref<5x16x128xf32, #tpu.memory_space<vmem>>, vector<1x8x128xf32>,
    %c2_58 = arith.constant 2 : index
    %c8_59 = arith.constant 8 : index
    %c0_60 = arith.constant 0 : index
    %96 = vector.load %arg7[%c2_58, %c8_59, %c0_60] : memref<5x16x128xf32, #tpu.memory_space<vmem>>, vector<1x8x128xf32>
    %97 = vector.shape_cast %96 : vector<1x8x128xf32> to vector<8x128xf32>
    %98 = vector.shape_cast %85 : vector<8x128xf32> to vector<1x8x128xf32>
    tpu.vector_store %arg7[%c2_58, %c8_59, %c0_60], %98 {strides = array<i32>} : memref<5x16x128xf32, #tpu.memory_space<vmem>>, vector<1x8x128xf32>,
    %c3_61 = arith.constant 3 : index
    %c8_62 = arith.constant 8 : index
    %c0_63 = arith.constant 0 : index
    %99 = vector.load %arg7[%c3_61, %c8_62, %c0_63] : memref<5x16x128xf32, #tpu.memory_space<vmem>>, vector<1x8x128xf32>
    %100 = vector.shape_cast %99 : vector<1x8x128xf32> to vector<8x128xf32>
    %101 = vector.shape_cast %87 : vector<8x128xf32> to vector<1x8x128xf32>
    tpu.vector_store %arg7[%c3_61, %c8_62, %c0_63], %101 {strides = array<i32>} : memref<5x16x128xf32, #tpu.memory_space<vmem>>, vector<1x8x128xf32>,
    %c4_64 = arith.constant 4 : index
    %c8_65 = arith.constant 8 : index
    %c0_66 = arith.constant 0 : index
    %102 = vector.load %arg7[%c4_64, %c8_65, %c0_66] : memref<5x16x128xf32, #tpu.memory_space<vmem>>, vector<1x8x128xf32>
    %103 = vector.shape_cast %102 : vector<1x8x128xf32> to vector<8x128xf32>
    %104 = vector.shape_cast %89 : vector<8x128xf32> to vector<1x8x128xf32>
    tpu.vector_store %arg7[%c4_64, %c8_65, %c0_66], %104 {strides = array<i32>} : memref<5x16x128xf32, #tpu.memory_space<vmem>>, vector<1x8x128xf32>,
    %c0_67 = arith.constant 0 : index
    %c2_68 = arith.constant 2 : index
    %c0_69 = arith.constant 0 : index
    %105 = vector.load %arg7[%c0_67, %c2_68, %c0_69] : memref<5x16x128xf32, #tpu.memory_space<vmem>>, vector<5x8x128xf32>
    %c0_70 = arith.constant 0 : index
    %c3_71 = arith.constant 3 : index
    %c0_72 = arith.constant 0 : index
    %106 = vector.load %arg7[%c0_70, %c3_71, %c0_72] : memref<5x16x128xf32, #tpu.memory_space<vmem>>, vector<5x8x128xf32>
    %107 = arith.addf %105, %106 : vector<5x8x128xf32>
    %c0_73 = arith.constant 0 : index
    %c4_74 = arith.constant 4 : index
    %c0_75 = arith.constant 0 : index
    %108 = vector.load %arg7[%c0_73, %c4_74, %c0_75] : memref<5x16x128xf32, #tpu.memory_space<vmem>>, vector<5x8x128xf32>
    %109 = arith.addf %107, %108 : vector<5x8x128xf32>
    %c0_76 = arith.constant 0 : index
    %c5_77 = arith.constant 5 : index
    %c0_78 = arith.constant 0 : index
    %110 = vector.load %arg7[%c0_76, %c5_77, %c0_78] : memref<5x16x128xf32, #tpu.memory_space<vmem>>, vector<5x8x128xf32>
    %111 = arith.addf %109, %110 : vector<5x8x128xf32>
    %c0_79 = arith.constant 0 : index
    %c6_80 = arith.constant 6 : index
    %c0_81 = arith.constant 0 : index
    %112 = vector.load %arg7[%c0_79, %c6_80, %c0_81] : memref<5x16x128xf32, #tpu.memory_space<vmem>>, vector<5x8x128xf32>
    %113 = arith.addf %111, %112 : vector<5x8x128xf32>
    %c0_82 = arith.constant 0 : index
    %c7 = arith.constant 7 : index
    %c0_83 = arith.constant 0 : index
    %114 = vector.load %arg7[%c0_82, %c7, %c0_83] : memref<5x16x128xf32, #tpu.memory_space<vmem>>, vector<5x8x128xf32>
    %115 = arith.addf %113, %114 : vector<5x8x128xf32>
    %c0_84 = arith.constant 0 : index
    %c8_85 = arith.constant 8 : index
    %c0_86 = arith.constant 0 : index
    %116 = vector.load %arg7[%c0_84, %c8_85, %c0_86] : memref<5x16x128xf32, #tpu.memory_space<vmem>>, vector<5x8x128xf32>
    %117 = arith.addf %115, %116 : vector<5x8x128xf32>
    %118 = vector.extract_strided_slice %117 {offsets = [0, 0, 0], sizes = [1, 8, 128], strides = [1, 1, 1]} : vector<5x8x128xf32> to vector<1x8x128xf32>
    %119 = vector.shape_cast %118 : vector<1x8x128xf32> to vector<8x128xf32>
    %cst_87 = arith.constant 0.0204081628 : f32
    %120 = vector.broadcast %cst_87 : f32 to vector<8x128xf32>
    %121 = arith.mulf %119, %120 : vector<8x128xf32>
    %122 = vector.extract_strided_slice %117 {offsets = [1, 0, 0], sizes = [1, 8, 128], strides = [1, 1, 1]} : vector<5x8x128xf32> to vector<1x8x128xf32>
    %123 = vector.shape_cast %122 : vector<1x8x128xf32> to vector<8x128xf32>
    %cst_88 = arith.constant 0.0204081628 : f32
    %124 = vector.broadcast %cst_88 : f32 to vector<8x128xf32>
    %125 = arith.mulf %123, %124 : vector<8x128xf32>
    %126 = arith.mulf %121, %121 : vector<8x128xf32>
    %127 = arith.mulf %125, %125 : vector<8x128xf32>
    %128 = arith.mulf %121, %125 : vector<8x128xf32>
    %129 = vector.extract_strided_slice %117 {offsets = [2, 0, 0], sizes = [1, 8, 128], strides = [1, 1, 1]} : vector<5x8x128xf32> to vector<1x8x128xf32>
    %130 = vector.shape_cast %129 : vector<1x8x128xf32> to vector<8x128xf32>
    %cst_89 = arith.constant 0.0204081628 : f32
    %131 = vector.broadcast %cst_89 : f32 to vector<8x128xf32>
    %132 = arith.mulf %130, %131 : vector<8x128xf32>
    %133 = arith.subf %132, %126 : vector<8x128xf32>
    %cst_90 = arith.constant 1.02083337 : f32
    %134 = vector.broadcast %cst_90 : f32 to vector<8x128xf32>
    %135 = arith.mulf %134, %133 : vector<8x128xf32>
    %136 = vector.extract_strided_slice %117 {offsets = [3, 0, 0], sizes = [1, 8, 128], strides = [1, 1, 1]} : vector<5x8x128xf32> to vector<1x8x128xf32>
    %137 = vector.shape_cast %136 : vector<1x8x128xf32> to vector<8x128xf32>
    %cst_91 = arith.constant 0.0204081628 : f32
    %138 = vector.broadcast %cst_91 : f32 to vector<8x128xf32>
    %139 = arith.mulf %137, %138 : vector<8x128xf32>
    %140 = arith.subf %139, %127 : vector<8x128xf32>
    %cst_92 = arith.constant 1.02083337 : f32
    %141 = vector.broadcast %cst_92 : f32 to vector<8x128xf32>
    %142 = arith.mulf %141, %140 : vector<8x128xf32>
    %143 = vector.extract_strided_slice %117 {offsets = [4, 0, 0], sizes = [1, 8, 128], strides = [1, 1, 1]} : vector<5x8x128xf32> to vector<1x8x128xf32>
    %144 = vector.shape_cast %143 : vector<1x8x128xf32> to vector<8x128xf32>
    %cst_93 = arith.constant 0.0204081628 : f32
    %145 = vector.broadcast %cst_93 : f32 to vector<8x128xf32>
    %146 = arith.mulf %144, %145 : vector<8x128xf32>
    %147 = arith.subf %146, %128 : vector<8x128xf32>
    %cst_94 = arith.constant 1.02083337 : f32
    %148 = vector.broadcast %cst_94 : f32 to vector<8x128xf32>
    %149 = arith.mulf %148, %147 : vector<8x128xf32>
    %cst_95 = arith.constant 2.000000e+00 : f32
    %150 = vector.broadcast %cst_95 : f32 to vector<8x128xf32>
    %151 = arith.mulf %150, %128 : vector<8x128xf32>
    %152 = vector.broadcast %4 : f32 to vector<8x128xf32>
    %153 = arith.addf %151, %152 : vector<8x128xf32>
    %cst_96 = arith.constant 2.000000e+00 : f32
    %154 = vector.broadcast %cst_96 : f32 to vector<8x128xf32>
    %155 = arith.mulf %154, %149 : vector<8x128xf32>
    %156 = vector.broadcast %7 : f32 to vector<8x128xf32>
    %157 = arith.addf %155, %156 : vector<8x128xf32>
    %158 = arith.addf %126, %127 : vector<8x128xf32>
    %159 = vector.broadcast %4 : f32 to vector<8x128xf32>
    %160 = arith.addf %158, %159 : vector<8x128xf32>
    %161 = arith.addf %135, %142 : vector<8x128xf32>
    %162 = vector.broadcast %7 : f32 to vector<8x128xf32>
    %163 = arith.addf %161, %162 : vector<8x128xf32>
    %164 = arith.mulf %153, %157 : vector<8x128xf32>
    %165 = arith.mulf %160, %163 : vector<8x128xf32>
    %166 = arith.divf %164, %165 : vector<8x128xf32>
    %167 = tpu.iota {dimensions = array<i32: 0>} : vector<8x128xi32>
    %c8_i32 = arith.constant 8 : i32
    %168 = arith.muli %arg2, %c8_i32 : i32
    %c6_i32 = arith.constant 6 : i32
    %169 = arith.subi %168, %c6_i32 : i32
    %170 = vector.broadcast %169 : i32 to vector<8x128xi32>
    %171 = arith.addi %167, %170 : vector<8x128xi32>
    %172 = tpu.iota {dimensions = array<i32: 1>} : vector<8x128xi32>
    %c0_i32_97 = arith.constant 0 : i32
    %173 = vector.broadcast %c0_i32_97 : i32 to vector<8x128xi32>
    %174 = arith.cmpi sge, %171, %173 : vector<8x128xi32>
    %c10_i32 = arith.constant 10 : i32
    %175 = vector.broadcast %c10_i32 : i32 to vector<8x128xi32>
    %176 = arith.cmpi slt, %171, %175 : vector<8x128xi32>
    %177 = arith.andi %174, %176 : vector<8x128xi1>
    %c10_i32_98 = arith.constant 10 : i32
    %178 = vector.broadcast %c10_i32_98 : i32 to vector<8x128xi32>
    %179 = arith.cmpi slt, %172, %178 : vector<8x128xi32>
    %180 = arith.andi %177, %179 : vector<8x128xi1>
    %cst_99 = arith.constant 0.000000e+00 : f32
    %181 = vector.broadcast %cst_99 : f32 to vector<8x128xf32>
    %182 = arith.select %180, %166, %181 : vector<8x128xi1>, vector<8x128xf32>
    %c0_i32_100 = arith.constant 0 : i32
    %183 = arith.cmpi eq, %arg2, %c0_i32_100 : i32
    %184 = arith.extui %183 : i1 to i32
    %c0_i32_101 = arith.constant 0 : i32
    %185 = arith.cmpi ne, %184, %c0_i32_101 : i32
    scf.if %185 {
      %cst_110 = arith.constant 0.000000e+00 : f32
      %192 = vector.broadcast %cst_110 : f32 to vector<8x128xf32>
      %c0_111 = arith.constant 0 : index
      %c0_112 = arith.constant 0 : index
      %c0_113 = arith.constant 0 : index
      %c0_114 = arith.constant 0 : index
      %193 = vector.load %arg6[%c0_111, %c0_112, %c0_113, %c0_114] : memref<1x1x8x128xf32, #tpu.memory_space<vmem>>, vector<1x1x8x128xf32>
      %194 = vector.shape_cast %193 : vector<1x1x8x128xf32> to vector<8x128xf32>
      %195 = vector.shape_cast %192 : vector<8x128xf32> to vector<1x1x8x128xf32>
      tpu.vector_store %arg6[%c0_111, %c0_112, %c0_113, %c0_114], %195 {strides = array<i32>} : memref<1x1x8x128xf32, #tpu.memory_space<vmem>>, vector<1x1x8x128xf32>,
    } else {
    }
    %c0_102 = arith.constant 0 : index
    %c0_103 = arith.constant 0 : index
    %c0_104 = arith.constant 0 : index
    %c0_105 = arith.constant 0 : index
    %186 = vector.load %arg6[%c0_102, %c0_103, %c0_104, %c0_105] : memref<1x1x8x128xf32, #tpu.memory_space<vmem>>, vector<1x1x8x128xf32>
    %187 = vector.shape_cast %186 : vector<1x1x8x128xf32> to vector<8x128xf32>
    %188 = arith.addf %187, %182 : vector<8x128xf32>
    %c0_106 = arith.constant 0 : index
    %c0_107 = arith.constant 0 : index
    %c0_108 = arith.constant 0 : index
    %c0_109 = arith.constant 0 : index
    %189 = vector.load %arg6[%c0_106, %c0_107, %c0_108, %c0_109] : memref<1x1x8x128xf32, #tpu.memory_space<vmem>>, vector<1x1x8x128xf32>
    %190 = vector.shape_cast %189 : vector<1x1x8x128xf32> to vector<8x128xf32>
    %191 = vector.shape_cast %188 : vector<8x128xf32> to vector<1x1x8x128xf32>
    tpu.vector_store %arg6[%c0_106, %c0_107, %c0_108, %c0_109], %191 {strides = array<i32>} : memref<1x1x8x128xf32, #tpu.memory_space<vmem>>, vector<1x1x8x128xf32>,
    return
  }
  func.func @transform_0(%arg0: i32, %arg1: i32, %arg2: i32) -> i32 {
    %c0_i32 = arith.constant 0 : i32
    %c0_i32_0 = arith.constant 0 : i32
    return %c0_i32 : i32
  }
  func.func @transform_1(%arg0: i32, %arg1: i32, %arg2: i32) -> (i32, i32, i32, i32) {
    %c0_i32 = arith.constant 0 : i32
    %c0_i32_0 = arith.constant 0 : i32
    return %arg0, %arg1, %arg2, %c0_i32 : i32, i32, i32, i32
  }
  func.func @transform_2(%arg0: i32, %arg1: i32, %arg2: i32) -> (i32, i32, i32, i32) {
    %c0_i32 = arith.constant 0 : i32
    %c0_i32_0 = arith.constant 0 : i32
    return %arg0, %arg1, %arg2, %c0_i32 : i32, i32, i32, i32
  }
  func.func @transform_3(%arg0: i32, %arg1: i32, %arg2: i32) -> (i32, i32, i32, i32) {
    %c0_i32 = arith.constant 0 : i32
    %c0_i32_0 = arith.constant 0 : i32
    %c0_i32_1 = arith.constant 0 : i32
    return %arg0, %arg1, %c0_i32, %c0_i32_0 : i32, i32, i32, i32
  }
}

</mosaic_0001>

<bundles_post_ra>
// kernel: tpu_custom_call.1
= control target key start
LH: loop header
LB: loop body
LE: loop exit
PB: predicated region body
PF: predicated region fallthrough
CT: control target
= control target key end

     0   :  { %s1703_s0 = inlined_call_operand.hbm [shape: f32[2], index: 0, kind: input, shape index: {}]   ;;  %s1704_s1 = inlined_call_operand.hbm [shape: f32[2,4,16,134], index: 1, kind: input, shape index: {}]   ;;  %s1705_s2 = inlined_call_operand.hbm [shape: f32[2,4,16,134], index: 2, kind: input, shape index: {}]   ;;  %s1706_s3 = inlined_call_operand.hbm [shape: f32[2,4,8,128], index: 3, kind: output, shape index: {}]  }
   0x1   :  { %1727 = sst [smem:[#allocation28_spill]] %s1703_s0 }
   0x2   :  { %1728 = sst [smem:[#allocation29_spill]] %s1706_s3 }
   0x3   :  { %8 = vsyncpa [#allocation6], 0 }
   0x4   :  { %9 = vsyncpa [#allocation4], 0 }
   0x5   :  { %11 = vsyncpa [#allocation4 + $0x1], 0 }
   0x6   :  { %12 = vsyncpa [#allocation9], 0 }
   0x7   :  { %14 = vsyncpa [#allocation9 + $0x1], 0 }
   0x8   :  { %15 = vsyncpa [#allocation5], 0 }
   0x9   :  { %17 = vsyncpa [#allocation5 + $0x1], 0  ;;  %s1227_s12 = smov 0   ;;  %s1229_s13 = smov 0  }
   0xa   :  { %s1231_s14 = smov 0   ;;  %s1233_s15 = smov 0  }
   0xb   :  { %s1235_s16 = smov 0   ;;  %s1237_s17 = smov 0  }
   0xc   :  { %s1239_s18 = smov 0   ;;  %s1241_s19 = smov 0  }
   0xd   :  { %s1243_s20 = smov 0   ;;  %s1245_s21 = smov 0  }
   0xe   :  { %s1247_s22 = smov 0   ;;  %s1249_s23 = smov 0  }
   0xf   :  { %s1251_s24 = smov 0  }
  0x10 LB: > { %1729 = sst [smem:[#allocation15_spill]] %s1146_s12  ;;  %s803_s25 = sadd.s32 4294967295, %s1194_s24   ;;  %s1194_s24 = sphi %s1251_s24, %s23_s24   ;;  %s1190_s23 = sphi %s1249_s23, %s1788_s23   ;;  %s1186_s22 = sphi %s1247_s22, %s1778_s22   ;;  %s1182_s21 = sphi %s1245_s21, %s1787_s21   ;;  %s1178_s20 = sphi %s1243_s20, %s1786_s20   ;;  %s1174_s19 = sphi %s1241_s19, %s1785_s19   ;;  %s1170_s18 = sphi %s1239_s18, %s1775_s18   ;;  %s1166_s17 = sphi %s1237_s17, %s1784_s17   ;;  %s1162_s16 = sphi %s1235_s16, %s1783_s16   ;;  %s1158_s15 = sphi %s1233_s15, %s1774_s15   ;;  %s1154_s14 = sphi %s1231_s14, %s1782_s14   ;;  %s1150_s13 = sphi %s1229_s13, %s1781_s13   ;;  %s1146_s12 = sphi %s1227_s12, %s1780_s12  }
  0x11   : > { %1730 = sst [smem:[#allocation16_spill]] %s1150_s13  ;;  %s804_s26 = sadd.s32 4294967294, %s1194_s24  }
  0x12   : > { %1731 = sst [smem:[#allocation17_spill]] %s1162_s16  ;;  %p87_p1 = scmp.ne.s32.totalorder %s1162_s16, %s1158_s15 }
  0x13   : > { %1732 = sst [smem:[#allocation18_spill]] %s1170_s18  ;;  %p1296_p2 = scmp.eq.s32.totalorder %s803_s25, 0 }
  0x14   : > { %1733 = sst [smem:[#allocation19_spill]] %s1174_s19  ;;  %p142_p3 = scmp.ne.s32.totalorder %s1154_s14, %s1150_s13 }
  0x15   : > { %1734 = sst [smem:[#allocation20_spill]] %s1178_s20  ;;  %p1305_p4 = por %p1296_p2, %p87_p1 }
  0x16   : > { %1735 = sst [smem:[#allocation21_spill]] %s1182_s21  ;;  %p143_p5 = scmp.eq.s32.totalorder %s803_s25, 15 }
  0x17   : > { %1736 = sst [smem:[#allocation22_spill]] %s1186_s22  ;;  %p148_p6 = scmp.ne.s32.totalorder %s1150_s13, %s1146_s12 }
  0x18   : > { %s1737_s28 = scalar_select %p1296_p2, 1, 0 }
  0x19   : > { %s1738_s30 = scalar_select %p1305_p4, 1, 0 }
  0x1a   : > { %p149_p7 = scmp.eq.s32.totalorder %s804_s26, 15  ;;  %p1311_p8 = por %p143_p5, %p142_p3 }
  0x1b   : > { %1739 = sst [smem:[#allocation23_spill]] %s1738_s30  ;;  %p805_p9 = scmp.ge.s32.totalorder %s1194_s24, 1 }
  0x1c   : > { %s1740_s4 = scalar_select %p1311_p8, 1, 0 }
  0x1d   : > { %p1316_p10 = por %p149_p7, %p148_p6  ;;  %p156_p11 = scmp.lt.s32.totalorder %s1194_s24, 17 }
  0x1e   : > { %1741 = sst [smem:[#allocation24_spill]] %s1740_s4  ;;  %s35_s7 = sadd.s32 1, %s1182_s21 }
  0x1f   : > { %s1742_s5 = scalar_select %p1316_p10, 1, 0 }
  0x20   : > { %p1321_p12 = pnand %p805_p9, %p156_p11  ;;  %s38_s8 = sadd.s32 1, %s1186_s22 }
  0x21   : > { %1743 = sst [smem:[#allocation25_spill]] %s1742_s5  ;;  %p36_p3 = scmp.ge.s32.totalorder %s35_s7, 2 }
  0x22   : > { %s1744_s6 = scalar_select %p1321_p12, 1, 0 }
  0x23   : > { %p842_p13 = pneg %p1321_p12  ;;  %s1745_s0 = sld [smem:[#allocation28_spill]] }
  0x25   : > { %p843_p1 = pnand %p842_p13, %p1296_p2 }
  0x27   : > { %p977_p6 = pneg %p843_p1 }
  0x29   : > { %s975_s11 = scalar_lea.hbm %s1745_s0, 16 }
  0x2a   : > { %p976_p5 = scmp.ne.s32.totalorder %s1745_s0, %s975_s11  ;;  %p982_p11 = scmp.lt.u32.totalorder %s975_s11, %s1745_s0 }
  0x2c   : > { %p978_p7 = pnand %p977_p6, %p976_p5 }
  0x2e   : > { %p979_p9 = pneg %p978_p7 }
  0x30   : > { %p984_p0 = pnand %p982_p11, %p979_p9 }
  0x32   : > { %987 = shalt.err (!%p984_p0)
}
  0x33   : > { %s1196_s29 = smov [#allocation3]   ;;  %s1790_s7 = smov (%p36_p3, %s35_s7), 0 }
  0x34   : > { %845 = dma.hbm_to_smem (!%p843_p1), %s1745_s0, 16, %s1196_s29, [#allocation6]  }
  0x35   : > { %1746 = sst [smem:[#allocation26_spill]] %s1790_s7  ;;  %s1792_s8 = smov (!%p36_p3, %s38_s8), %s1186_s22 }
  0x36   : > { %s42_s27 = sadd.s32 1, %s1190_s23  ;;  %s70_s12 = ssub.s32 %s1182_s21, %s1790_s7 }
  0x37   : > { %p40_p0 = scmp.ge.s32.totalorder %s1792_s8, 4  ;;  %p82_p13 = scmp.eq.s32.totalorder %s1194_s24, 0 }
  0x38   : > { %p858_p5 = scmp.lt.s32.totalorder %s1194_s24, 16  ;;  %s1352_s5 = sand.u32 1, %s1166_s17  }
  0x39   : > { %s1794_s8 = smov (%p40_p0, %s1792_s8), 0  ;;  %s1796_s27 = smov (!%p40_p0, %s42_s27), %s1190_s23 }
  0x3a   : > { %1747 = sst [smem:[#allocation27_spill]] %s1794_s8  ;;  %s68_s29 = ssub.s32 %s1186_s22, %s1794_s8 }
  0x3b   : > { %p1748_p1 = scmp.ne.s32.totalorder %s1166_s17, %s1162_s16  ;;  %p44_p6 = scmp.ge.s32.totalorder %s1796_s27, 2 }
  0x3c   : > { %s808_s10 = sshll.u32 %s1352_s5, 4  ;;  %s809_s11 = sshll.u32 %s1182_s21, 1 }
  0x3d   : > { %p1362_p3 = por %p82_p13, %p1748_p1  ;;  %s1798_s27 = smov (%p44_p6, %s1796_s27), 0 }
  0x3e   : > { %s810_s15 = sshll.u32 %s1186_s22, 2  ;;  %s67_s25 = ssub.s32 %s1190_s23, %s1798_s27 }
  0x3f   : > { %s188_s26 = sadd.s32 %s810_s15, %s809_s11  ;;  %s69_s0 = sor.u32 %s68_s29, %s67_s25 }
  0x40   : > { %s811_s8 = sshll.u32 %s1190_s23, 4  ;;  %s71_s7 = sor.u32 %s70_s12, %s69_s0 }
  0x41   : > { %p130_p7 = scmp.eq.s32.totalorder %s69_s0, 0  ;;  %p72_p9 = scmp.eq.s32.totalorder %s71_s7, 0 }
  0x42   : > { %s190_s3 = sadd.s32 %s811_s8, %s188_s26  ;;  %s1750_s4 = sadd.s32 1, %s1154_s14 }
  0x43   : > { %s1377_s19 = scalar_select %p130_p7, %s1154_s14, %s1750_s4  }
  0x44   : > { %s1751_s18 = sadd.s32 1, %s1166_s17  ;;  %s812_s20 = sshll.u32 %s190_s3, 7 }
  0x45   : > { %s1382_s21 = scalar_select %p72_p9, %s1166_s17, %s1751_s18  }
  0x46   : > { %s182_s13 = scalar_lea.vmem [#allocation7], %s808_s10  ;;  %s1387_s11 = scalar_lea.hbm %s1704_s1, %s812_s20 }
  0x47   : > { %s194_s22 = sshll.u32 %s182_s13, 4  ;;  %p1395_p11 = pnand %p858_p5, %p1362_p3  ;;  %s1389_s22 = int_to_ptr.vmem [resolvable:$true] %s194_s22 }
  0x48   : > { %s1402_s13 = scalar_lea.hbm %s1705_s2, %s812_s20  ;;  %s1404_s16 = scalar_lea.vmem [#allocation8], %s808_s10 }
  0x49   : > { %s217_s30 = sshll.u32 %s1404_s16, 4  ;;  %s179_s4 = scalar_lea.sflag [#allocation4], %s1352_s5  ;;  %s218_s30 = int_to_ptr.vmem [resolvable:$true] %s217_s30 }
  0x4a   : > { %s988_s7 = scalar_lea.hbm %s1387_s11, 256  ;;  %p990_p13 = pneg %p1395_p11 }
  0x4b   : > { %p989_p0 = scmp.ne.s32.totalorder %s1387_s11, %s988_s7  ;;  %s993_s29 = scalar_lea.hbm %s1704_s1, 4096 }
  0x4c   : > { %p994_p3 = scmp.lt.u32.totalorder %s1387_s11, %s1704_s1  ;;  %p995_p6 = scmp.lt.u32.totalorder %s993_s29, %s988_s7 }
  0x4d   : > { %p991_p5 = pnand %p990_p13, %p989_p0  ;;  %p997_p9 = scmp.lt.u32.totalorder %s988_s7, %s1387_s11 }
  0x4e   : > { %p996_p7 = por %p995_p6, %p994_p3 }
  0x4f   : > { %p992_p1 = pneg %p991_p5 }
  0x50   : > { %p998_p10 = por %p997_p9, %p996_p7 }
  0x52   : > { %p999_p8 = pnand %p998_p10, %p992_p1 }
  0x54   : > { %1002 = shalt.err (!%p999_p8)
}
  0x55   : > { %s1003_s10 = scalar_lea.vmem %s1389_s22, 256  ;;  %s1197_s15 = smov [#allocation7]  }
  0x56   : > { %p1004_p0 = scmp.ne.s32.totalorder %s1389_s22, %s1003_s10  ;;  %s1008_s25 = sshll.u32 %s1197_s15, 4  ;;  %s1009_s25 = int_to_ptr.vmem [resolvable:$false] %s1008_s25 }
  0x57   : > { %s1010_s26 = scalar_lea.vmem %s1009_s25, 512  ;;  %p1011_p2 = scmp.lt.s32.totalorder %s1389_s22, %s1009_s25 }
  0x58   : > { %p1006_p5 = pnand %p1004_p0, %p990_p13  ;;  %p1012_p3 = scmp.lt.s32.totalorder %s1010_s26, %s1003_s10 }
  0x5a   : > { %p1007_p4 = pneg %p1006_p5  ;;  %p1013_p6 = por %p1012_p3, %p1011_p2 }
  0x5c   : > { %p1014_p7 = pnand %p1013_p6, %p1007_p4 }
  0x5e   : > { %1017 = shalt.err (!%p1014_p7)
}
  0x5f   : > { %849 = dma.hbm_to_vmem [thread:$0]  (!%p1395_p11), %s1387_s11, 256, %s1389_s22, %s179_s4  }
  0x60   : > { %s202_s3 = scalar_lea.sflag [#allocation9], %s1352_s5  ;;  %s1018_s18 = scalar_lea.hbm %s1402_s13, 256 }
  0x61   : > { %p1019_p8 = scmp.ne.s32.totalorder %s1402_s13, %s1018_s18  ;;  %s1023_s12 = scalar_lea.hbm %s1705_s2, 4096 }
  0x62   : > { %p1024_p10 = scmp.lt.u32.totalorder %s1402_s13, %s1705_s2  ;;  %p1025_p1 = scmp.lt.u32.totalorder %s1023_s12, %s1018_s18 }
  0x63   : > { %p1021_p2 = pnand %p1019_p8, %p990_p13  ;;  %p1027_p0 = scmp.lt.u32.totalorder %s1018_s18, %s1402_s13 }
  0x64   : > { %p1026_p9 = por %p1025_p1, %p1024_p10 }
  0x65   : > { %p1022_p4 = pneg %p1021_p2 }
  0x66   : > { %p1028_p5 = por %p1027_p0, %p1026_p9 }
  0x68   : > { %p1029_p3 = pnand %p1028_p5, %p1022_p4 }
  0x6a   : > { %1032 = shalt.err (!%p1029_p3)
}
  0x6b   : > { %s1033_s22 = scalar_lea.vmem %s218_s30, 256  ;;  %s1198_s5 = smov [#allocation8]  }
  0x6c   : > { %p1034_p6 = scmp.ne.s32.totalorder %s218_s30, %s1033_s22  ;;  %s1038_s11 = sshll.u32 %s1198_s5, 4  ;;  %s1039_s11 = int_to_ptr.vmem [resolvable:$false] %s1038_s11 }
  0x6d   : > { %s1040_s16 = scalar_lea.vmem %s1039_s11, 512  ;;  %p1041_p2 = scmp.lt.s32.totalorder %s218_s30, %s1039_s11 }
  0x6e   : > { %p1036_p7 = pnand %p1034_p6, %p990_p13  ;;  %p1042_p12 = scmp.lt.s32.totalorder %s1040_s16, %s1033_s22 }
  0x70   : > { %p1037_p8 = pneg %p1036_p7  ;;  %p1043_p1 = por %p1042_p12, %p1041_p2 }
  0x72   : > { %p1044_p10 = pnand %p1043_p1, %p1037_p8 }
  0x74   : > { %1047 = shalt.err (!%p1044_p10)
}
  0x75   : > { %852 = dma.hbm_to_vmem [thread:$0]  (!%p1395_p11), %s1402_s13, 256, %s218_s30, %s202_s3  }
  0x76   : > { %p1753_p4 = scmp.ne.s32.totalorder %s1744_s6, 0 }
  0x77   : > { %p1754_p9 = scmp.ne.s32.totalorder (!%p1753_p4), %s1737_s28, 0 }
  0x78   : > { %226 = sbr.rel (%p1753_p4) target bundleno = 458 (0x1ca), region = 32 }
  0x7f   : > { %1129 = dma.done.wait (%p1754_p9), [#allocation6], 16  }
  0x80   : > { %1131 = vsyncadd (%p1754_p9), [#allocation6], 4294967280  ;;  %s1755_s4 = sld [smem:[#allocation17_spill]]  ;;  %s1756_s20 = sld [smem:[#allocation23_spill]] }
  0x86   : > { %s232_s10 = sand.u32 1, %s1755_s4   ;;  %p1757_p12 = scmp.ne.s32.totalorder %s1756_s20, 0 }
  0x87   : > { %s820_s15 = sshll.u32 %s232_s10, 4  ;;  %s233_s25 = scalar_lea.sflag [#allocation4], %s232_s10 }
  0x88   : > { %s1462_s26 = scalar_lea.vmem [#allocation7], %s820_s15 }
  0x89   : > { %1133 = dma.done.wait (%p1757_p12), %s233_s25, 256  }
  0x8a   : > { %1135 = vsyncadd (%p1757_p12), %s233_s25, 4294967040  ;;  %s242_s6 = scalar_lea.sflag [#allocation9], %s232_s10  ;;  %s1468_s0 = scalar_lea.vmem [#allocation8], %s820_s15 }
  0x8b   : > { %1137 = dma.done.wait (%p1757_p12), %s242_s6, 256  }
  0x8c   : > { %1139 = vsyncadd (%p1757_p12), %s242_s6, 4294967040 }
  0x8d   : > { %250 = sfence }
  0x8e   : > { %s1758_s28 = sld [smem:[#allocation16_spill]]  ;;  %s1759_s13 = sld [smem:[#allocation20_spill]] }
  0x8f   : > { %s1760_s22 = sld [smem:[#allocation18_spill]] }
  0x94   : > { %s271_s30 = sand.u32 1, %s1758_s28   ;;  %s274_s3 = sld [smem:[#allocation3 + %s1759_s13]] }
  0x95   : > { %s822_s18 = sshll.u32 %s271_s30, 3  ;;  %p823_p11 = scmp.le.s32.totalorder %s1760_s22, 0 }
  0x96   : > { %s1482_s9 = scalar_lea.vmem [#allocation10], %s822_s18  ;;  %v283_v0 = vld [vmem:[#allocation2 + $0xa] sm:$0x3f] (!%p823_p11)  ;;  %v284_v1 = vld [vmem:[#allocation2 + $0x1a] sm:$0x3f] (!%p823_p11) }
  0x97   : > { %282 = sbr.rel (%p823_p11) target bundleno = 158 (0x9e), region = 48  ;;  %v285_v2 = vld [vmem:[#allocation2 + $0x2a] sm:$0x3f] (!%p823_p11)  ;;  %288 = vst [vmem:[#allocation2 + $0x2] sm:$0x3f] (!%p823_p11), %v283_v0 }
  0x98   : > { %289 = vst [vmem:[#allocation2 + $0x12] sm:$0x3f] (!%p823_p11), %v284_v1  ;;  %290 = vst [vmem:[#allocation2 + $0x22] sm:$0x3f] (!%p823_p11), %v285_v2  ;;  %v286_v3 = vld [vmem:[#allocation2 + $0x3a] sm:$0x3f] (!%p823_p11) }
  0x99   : > { %v287_v4 = vld [vmem:[#allocation2 + $0x4a] sm:$0x3f] (!%p823_p11)  ;;  %291 = vst [vmem:[#allocation2 + $0x32] sm:$0x3f] (!%p823_p11), %v286_v3 }
  0x9a   : > { %s275_s7 = smul.f32 0.01, %s274_s3  ;;  %292 = vst [vmem:[#allocation2 + $0x42] sm:$0x3f] (!%p823_p11), %v287_v4 }
  0x9b   : > { %s277_s8 = smul.f32 0.03, %s274_s3 }
  0x9c   : > { %s1478_s12 = smul.f32 %s275_s7, %s275_s7 }
  0x9d   : > { %s1480_s29 = smul.f32 %s277_s8, %s277_s8 }
  0x9e PF: > { %v1486_v5 = vld [vmem:[%s1468_s0] sm:$0xff]  ;;  %s1199_s5 = smov 127   ;;  %v299_v7 = vld [vmem:[%s1468_s0 + $0x8] sm:$0xff]  ;;  %s1200_s11 = smov 126   ;;  %vm306_vm0 = vcmask 1039360   ;;  %vm353_vm1 = vcmask 1031168  }
  0x9f   : > { %v1489_v6 = vld [vmem:[%s1462_s26] sm:$0xff]  ;;  %312 = vrot.lane.b32.xlu1 %v1486_v5, %s1199_s5  ;;  %v298_v8 = vld [vmem:[%s1462_s26 + $0x8] sm:$0xff]  ;;  %v329_v11 = vmul.f32 %v299_v7, %v299_v7  ;;  %v1508_v12 = vmul.f32 %v1486_v5, %v1486_v5  ;;  %s1201_s16 = smov 125   ;;  %s1202_s4 = smov 124   ;;  %vm389_vm2 = vcmask 1022976   ;;  %vm425_vm3 = vcmask 1014784  }
  0xa0   : > { %302 = vrot.lane.b32.xlu0 %v1489_v6, %s1199_s5  ;;  %v319_v9 = vmul.f32 %v298_v8, %v298_v8  ;;  %v1501_v10 = vmul.f32 %v1489_v6, %v1489_v6  ;;  %s1203_s20 = smov 123   ;;  %s1204_s10 = smov 122   ;;  %v339_v13 = vmul.f32 %v299_v7, %v298_v8  ;;  %v1559_v14 = vmul.f32 %v1486_v5, %v1489_v6 }
  0xa1   : > { %vm461_vm4 = vcmask 1006592   ;;  %vm497_vm5 = vcmask 998400   ;;  %s1761_s15 = sld [smem:[#allocation18_spill]] }
  0xa3   : > { %314 = vrot.lane.b32.xlu1 %v299_v7, %s1199_s5 }
  0xa4   : > { %304 = vrot.lane.b32.xlu0 %v298_v8, %s1199_s5 }
  0xa7   : > { %324 = vrot.lane.b32.xlu1 %v319_v9, %s1199_s5  ;;  %s824_s25 = sshll.u32 %s1761_s15, 3  ;;  %p826_p13 = scmp.ne.s32.totalorder %s1761_s15, 0 }
  0xa8   : > { %322 = vrot.lane.b32.xlu0 %v1501_v10, %s1199_s5  ;;  %s825_s26 = sadd.s32 4294967290, %s824_s25 }
  0xab   : > { %334 = vrot.lane.b32.xlu1 %v329_v11, %s1199_s5 }
  0xac   : > { %332 = vrot.lane.b32.xlu0 %v1508_v12, %s1199_s5 }
  0xaf   : > { %351 = vrot.lane.b32.xlu1 %v298_v8, %s1200_s11 }
  0xb0   : > { %349 = vrot.lane.b32.xlu0 %v1489_v6, %s1200_s11 }
  0xb3   : > { %359 = vrot.lane.b32.xlu1 %v299_v7, %s1200_s11 }
  0xb4   : > { %357 = vrot.lane.b32.xlu0 %v1486_v5, %s1200_s11 }
  0xb7   : > { %366 = vrot.lane.b32.xlu1 %v319_v9, %s1200_s11 }
  0xb8   : > { %364 = vrot.lane.b32.xlu0 %v1501_v10, %s1200_s11 }
  0xbb   : > { %373 = vrot.lane.b32.xlu1 %v329_v11, %s1200_s11 }
  0xbc   : > { %371 = vrot.lane.b32.xlu0 %v1508_v12, %s1200_s11 }
  0xbf   : > { %387 = vrot.lane.b32.xlu1 %v298_v8, %s1201_s16 }
  0xc0   : > { %385 = vrot.lane.b32.xlu0 %v1489_v6, %s1201_s16 }
  0xc3   : > { %395 = vrot.lane.b32.xlu1 %v299_v7, %s1201_s16 }
  0xc4   : > { %393 = vrot.lane.b32.xlu0 %v1486_v5, %s1201_s16 }
  0xc7   : > { %402 = vrot.lane.b32.xlu1 %v319_v9, %s1201_s16 }
  0xc8   : > { %400 = vrot.lane.b32.xlu0 %v1501_v10, %s1201_s16 }
  0xcb   : > { %409 = vrot.lane.b32.xlu1 %v329_v11, %s1201_s16 }
  0xcc   : > { %407 = vrot.lane.b32.xlu0 %v1508_v12, %s1201_s16 }
  0xcf   : > { %423 = vrot.lane.b32.xlu1 %v298_v8, %s1202_s4 }
  0xd0   : > { %421 = vrot.lane.b32.xlu0 %v1489_v6, %s1202_s4 }
  0xd3   : > { %431 = vrot.lane.b32.xlu1 %v299_v7, %s1202_s4 }
  0xd4   : > { %429 = vrot.lane.b32.xlu0 %v1486_v5, %s1202_s4 }
  0xd7   : > { %438 = vrot.lane.b32.xlu1 %v319_v9, %s1202_s4 }
  0xd8   : > { %436 = vrot.lane.b32.xlu0 %v1501_v10, %s1202_s4 }
  0xdb   : > { %445 = vrot.lane.b32.xlu1 %v329_v11, %s1202_s4 }
  0xdc   : > { %443 = vrot.lane.b32.xlu0 %v1508_v12, %s1202_s4 }
  0xdf   : > { %459 = vrot.lane.b32.xlu1 %v298_v8, %s1203_s20 }
  0xe0   : > { %457 = vrot.lane.b32.xlu0 %v1489_v6, %s1203_s20 }
  0xe3   : > { %467 = vrot.lane.b32.xlu1 %v299_v7, %s1203_s20 }
  0xe4   : > { %465 = vrot.lane.b32.xlu0 %v1486_v5, %s1203_s20 }
  0xe7   : > { %474 = vrot.lane.b32.xlu1 %v319_v9, %s1203_s20 }
  0xe8   : > { %472 = vrot.lane.b32.xlu0 %v1501_v10, %s1203_s20 }
  0xeb   : > { %481 = vrot.lane.b32.xlu1 %v329_v11, %s1203_s20 }
  0xec   : > { %479 = vrot.lane.b32.xlu0 %v1508_v12, %s1203_s20 }
  0xef   : > { %495 = vrot.lane.b32.xlu1 %v298_v8, %s1204_s10 }
  0xf0   : > { %493 = vrot.lane.b32.xlu0 %v1489_v6, %s1204_s10 }
  0xf3   : > { %503 = vrot.lane.b32.xlu1 %v299_v7, %s1204_s10 }
  0xf4   : > { %501 = vrot.lane.b32.xlu0 %v1486_v5, %s1204_s10 }
  0xf7   : > { %510 = vrot.lane.b32.xlu1 %v319_v9, %s1204_s10 }
  0xf8   : > { %508 = vrot.lane.b32.xlu0 %v1501_v10, %s1204_s10 }
  0xfb   : > { %517 = vrot.lane.b32.xlu1 %v329_v11, %s1204_s10 }
  0xfc   : > { %515 = vrot.lane.b32.xlu0 %v1508_v12, %s1204_s10 }
  0xff   : > { %344 = vrot.lane.b32.xlu1 %v339_v13, %s1199_s5 }
 0x100   : > { %342 = vrot.lane.b32.xlu0 %v1559_v14, %s1199_s5 }
 0x103   : > { %380 = vrot.lane.b32.xlu1 %v339_v13, %s1200_s11 }
 0x104   : > { %378 = vrot.lane.b32.xlu0 %v1559_v14, %s1200_s11 }
 0x107   : > { %416 = vrot.lane.b32.xlu1 %v339_v13, %s1201_s16 }
 0x108   : > { %414 = vrot.lane.b32.xlu0 %v1559_v14, %s1201_s16 }
 0x10b   : > { %452 = vrot.lane.b32.xlu1 %v339_v13, %s1202_s4 }
 0x10c   : > { %450 = vrot.lane.b32.xlu0 %v1559_v14, %s1202_s4 }
 0x10f   : > { %488 = vrot.lane.b32.xlu1 %v339_v13, %s1203_s20 }
 0x110   : > { %486 = vrot.lane.b32.xlu0 %v1559_v14, %s1203_s20 }
 0x111   : > { %v313_v15 = vpop.permute.xlu1 %312 }
 0x112   : > { %v303_v16 = vpop.permute.xlu0 %302 }
 0x113   : > { %524 = vrot.lane.b32.xlu1 %v339_v13, %s1204_s10 }
 0x114   : > { %522 = vrot.lane.b32.xlu0 %v1559_v14, %s1204_s10 }
 0x115   : > { %v315_v17 = vpop.permute.xlu1 %314 }
 0x116   : > { %v305_v18 = vpop.permute.xlu0 %304  ;;  %v316_v19 = vsel %vm306_vm0, %v313_v15, %v315_v17 }
 0x117   : > { %v307_v20 = vsel %vm306_vm0, %v303_v16, %v305_v18  ;;  %v318_v63 = vadd.f32 %v316_v19, %v1486_v5 }
 0x118   : > { %v309_v56 = vadd.f32 %v307_v20, %v1489_v6 }
 0x119   : > { %v325_v21 = vpop.permute.xlu1 %324 }
 0x11a   : > { %v323_v22 = vpop.permute.xlu0 %322 }
 0x11b   : > { %v326_v23 = vsel %vm306_vm0, %v323_v22, %v325_v21 }
 0x11c   : > { %v328_v11 = vadd.f32 %v326_v23, %v1501_v10 }
 0x11d   : > { %v335_v24 = vpop.permute.xlu1 %334 }
 0x11e   : > { %v333_v25 = vpop.permute.xlu0 %332 }
 0x11f   : > { %v1579_v26 = vsel %vm306_vm0, %v333_v25, %v335_v24 }
 0x120   : > { %v338_v10 = vadd.f32 %v1579_v26, %v1508_v12 }
 0x121   : > { %v352_v27 = vpop.permute.xlu1 %351 }
 0x122   : > { %v350_v28 = vpop.permute.xlu0 %349 }
 0x123   : > { %v354_v55 = vsel %vm353_vm1, %v350_v28, %v352_v27 }
 0x124   : > { %v356_v60 = vadd.f32 %v354_v55, %v309_v56 }
 0x125   : > { %v360_v29 = vpop.permute.xlu1 %359 }
 0x126   : > { %v358_v30 = vpop.permute.xlu0 %357 }
 0x127   : > { %v361_v61 = vsel %vm353_vm1, %v358_v30, %v360_v29 }
 0x128   : > { %v363_v6 = vadd.f32 %v361_v61, %v318_v63 }
 0x129   : > { %v367_v31 = vpop.permute.xlu1 %366 }
 0x12a   : > { %v365_v32 = vpop.permute.xlu0 %364 }
 0x12b   : > { %v368_v8 = vsel %vm353_vm1, %v365_v32, %v367_v31 }
 0x12c   : > { %v370_v20 = vadd.f32 %v368_v8, %v328_v11 }
 0x12d   : > { %v374_v33 = vpop.permute.xlu1 %373 }
 0x12e   : > { %v372_v34 = vpop.permute.xlu0 %371 }
 0x12f   : > { %v375_v24 = vsel %vm353_vm1, %v372_v34, %v374_v33 }
 0x131   : > { %v388_v35 = vpop.permute.xlu1 %387 }
 0x132   : > { %v386_v36 = vpop.permute.xlu0 %385 }
 0x133   : > { %v390_v59 = vsel %vm389_vm2, %v386_v36, %v388_v35  ;;  %v377_v35 = vadd.f32 %v375_v24, %v338_v10 }
 0x134   : > { %v392_v0 = vadd.f32 %v390_v59, %v356_v60 }
 0x135   : > { %v396_v37 = vpop.permute.xlu1 %395 }
 0x136   : > { %v394_v38 = vpop.permute.xlu0 %393 }
 0x137   : > { %v397_v3 = vsel %vm389_vm2, %v394_v38, %v396_v37 }
 0x138   : > { %v399_v13 = vadd.f32 %v397_v3, %v363_v6 }
 0x139   : > { %v403_v39 = vpop.permute.xlu1 %402 }
 0x13a   : > { %v401_v40 = vpop.permute.xlu0 %400 }
 0x13b   : > { %v404_v17 = vsel %vm389_vm2, %v401_v40, %v403_v39 }
 0x13c   : > { %v406_v23 = vadd.f32 %v404_v17, %v370_v20 }
 0x13d   : > { %v410_v41 = vpop.permute.xlu1 %409 }
 0x13e   : > { %v408_v42 = vpop.permute.xlu0 %407 }
 0x13f   : > { %v411_v30 = vsel %vm389_vm2, %v408_v42, %v410_v41 }
 0x140   : > { %v413_v34 = vadd.f32 %v411_v30, %v377_v35 }
 0x141   : > { %v424_v43 = vpop.permute.xlu1 %423 }
 0x142   : > { %v422_v44 = vpop.permute.xlu0 %421 }
 0x143   : > { %v426_v62 = vsel %vm425_vm3, %v422_v44, %v424_v43 }
 0x144   : > { %v428_v7 = vadd.f32 %v426_v62, %v392_v0 }
 0x145   : > { %v432_v45 = vpop.permute.xlu1 %431 }
 0x146   : > { %v430_v46 = vpop.permute.xlu0 %429 }
 0x147   : > { %v433_v9 = vsel %vm425_vm3, %v430_v46, %v432_v45 }
 0x148   : > { %v435_v21 = vadd.f32 %v433_v9, %v399_v13 }
 0x149   : > { %v439_v47 = vpop.permute.xlu1 %438 }
 0x14a   : > { %v437_v48 = vpop.permute.xlu0 %436 }
 0x14b   : > { %v440_v25 = vsel %vm425_vm3, %v437_v48, %v439_v47 }
 0x14c   : > { %v442_v36 = vadd.f32 %v440_v25, %v406_v23 }
 0x14d   : > { %v446_v49 = vpop.permute.xlu1 %445 }
 0x14e   : > { %v444_v50 = vpop.permute.xlu0 %443 }
 0x14f   : > { %v447_v33 = vsel %vm425_vm3, %v444_v50, %v446_v49 }
 0x150   : > { %v449_v43 = vadd.f32 %v447_v33, %v413_v34 }
 0x151   : > { %v460_v51 = vpop.permute.xlu1 %459 }
 0x152   : > { %v458_v52 = vpop.permute.xlu0 %457 }
 0x153   : > { %v462_v4 = vsel %vm461_vm4, %v458_v52, %v460_v51 }
 0x154   : > { %v464_v15 = vadd.f32 %v462_v4, %v428_v7 }
 0x155   : > { %v468_v53 = vpop.permute.xlu1 %467 }
 0x156   : > { %v466_v54 = vpop.permute.xlu0 %465 }
 0x157   : > { %v469_v18 = vsel %vm461_vm4, %v466_v54, %v468_v53 }
 0x158   : > { %v471_v27 = vadd.f32 %v469_v18, %v435_v21 }
 0x159   : > { %v475_v57 = vpop.permute.xlu1 %474 }
 0x15a   : > { %v473_v58 = vpop.permute.xlu0 %472 }
 0x15b   : > { %v476_v31 = vsel %vm461_vm4, %v473_v58, %v475_v57 }
 0x15c   : > { %v478_v38 = vadd.f32 %v476_v31, %v442_v36 }
 0x15d   : > { %v482_v1 = vpop.permute.xlu1 %481 }
 0x15e   : > { %v480_v2 = vpop.permute.xlu0 %479 }
 0x15f   : > { %v483_v39 = vsel %vm461_vm4, %v480_v2, %v482_v1 }
 0x160   : > { %v485_v45 = vadd.f32 %v483_v39, %v449_v43 }
 0x161   : > { %v496_v16 = vpop.permute.xlu1 %495 }
 0x162   : > { %v494_v5 = vpop.permute.xlu0 %493 }
 0x163   : > { %v498_v19 = vsel %vm497_vm5, %v494_v5, %v496_v16 }
 0x164   : > { %v500_v22 = vadd.f32 %v498_v19, %v464_v15 }
 0x165   : > { %v504_v28 = vpop.permute.xlu1 %503 }
 0x166   : > { %529 = vst [vmem:[#allocation2 + $0x8] sm:$0xff] %v500_v22  ;;  %v502_v29 = vpop.permute.xlu0 %501 }
 0x167   : > { %v505_v32 = vsel %vm497_vm5, %v502_v29, %v504_v28 }
 0x168   : > { %v507_v37 = vadd.f32 %v505_v32, %v471_v27 }
 0x169   : > { %v511_v12 = vpop.permute.xlu1 %510 }
 0x16a   : > { %531 = vst [vmem:[#allocation2 + $0x18] sm:$0xff] %v507_v37  ;;  %v509_v26 = vpop.permute.xlu0 %508 }
 0x16b   : > { %v512_v40 = vsel %vm497_vm5, %v509_v26, %v511_v12 }
 0x16c   : > { %v1605_v41 = vadd.f32 %v512_v40, %v478_v38 }
 0x16d   : > { %v538_v42 = vld [vmem:[#allocation2 + $0x2] sm:$0xff]  ;;  %v518_v47 = vpop.permute.xlu1 %517 }
 0x16e   : > { %v543_v44 = vld [vmem:[#allocation2 + $0x3] sm:$0xff]  ;;  %533 = vst [vmem:[#allocation2 + $0x28] sm:$0xff] %v1605_v41  ;;  %v516_v48 = vpop.permute.xlu0 %515 }
 0x16f   : > { %v548_v46 = vadd.f32 %v543_v44, %v538_v42  ;;  %v553_v49 = vld [vmem:[#allocation2 + $0x4] sm:$0xff]  ;;  %v519_v50 = vsel %vm497_vm5, %v516_v48, %v518_v47 }
 0x170   : > { %v1609_v52 = vadd.f32 %v519_v50, %v485_v45  ;;  %v563_v53 = vld [vmem:[#allocation2 + $0x5] sm:$0xff] }
 0x171   : > { %v558_v51 = vadd.f32 %v553_v49, %v548_v46  ;;  %v539_v54 = vld [vmem:[#allocation2 + $0x12] sm:$0xff]  ;;  %v345_v58 = vpop.permute.xlu1 %344  ;;  %v573_v60 = vld [vmem:[#allocation2 + $0x6] sm:$0xff] }
 0x172   : > { %v544_v55 = vld [vmem:[#allocation2 + $0x13] sm:$0xff]  ;;  %535 = vst [vmem:[#allocation2 + $0x38] sm:$0xff] %v1609_v52  ;;  %v343_v59 = vpop.permute.xlu0 %342  ;;  %v583_v63 = vld [vmem:[#allocation2 + $0x7] sm:$0xff] }
 0x173   : > { %v568_v56 = vadd.f32 %v563_v53, %v558_v51  ;;  %v549_v57 = vadd.f32 %v544_v55, %v539_v54  ;;  %v554_v61 = vld [vmem:[#allocation2 + $0x14] sm:$0xff]  ;;  %v346_v10 = vsel %vm306_vm0, %v343_v59, %v345_v58 }
 0x174   : > { %v564_v1 = vld [vmem:[#allocation2 + $0x15] sm:$0xff]  ;;  %v348_v34 = vadd.f32 %v346_v10, %v1559_v14 }
 0x175   : > { %v578_v62 = vadd.f32 %v573_v60, %v568_v56  ;;  %v559_v0 = vadd.f32 %v554_v61, %v549_v57  ;;  %v540_v2 = vld [vmem:[#allocation2 + $0x22] sm:$0xff]  ;;  %v381_v8 = vpop.permute.xlu1 %380  ;;  %v574_v11 = vld [vmem:[#allocation2 + $0x16] sm:$0xff] }
 0x176   : > { %v545_v3 = vld [vmem:[#allocation2 + $0x23] sm:$0xff]  ;;  %v379_v9 = vpop.permute.xlu0 %378  ;;  %v584_v5 = vld [vmem:[#allocation2 + $0x17] sm:$0xff] }
 0x177   : > { %v588_v4 = vadd.f32 %v583_v63, %v578_v62  ;;  %v569_v6 = vadd.f32 %v564_v1, %v559_v0  ;;  %v550_v7 = vadd.f32 %v545_v3, %v540_v2  ;;  %v555_v13 = vld [vmem:[#allocation2 + $0x24] sm:$0xff] }
 0x178   : > { %v565_v18 = vld [vmem:[#allocation2 + $0x25] sm:$0xff] }
 0x179   : > { %v598_v15 = vadd.f32 %v588_v4, %v500_v22  ;;  %v579_v16 = vadd.f32 %v574_v11, %v569_v6  ;;  %v560_v17 = vadd.f32 %v555_v13, %v550_v7  ;;  %v541_v19 = vld [vmem:[#allocation2 + $0x32] sm:$0xff]  ;;  %v417_v23 = vpop.permute.xlu1 %416  ;;  %v575_v29 = vld [vmem:[#allocation2 + $0x26] sm:$0xff]  ;;  %v382_v22 = vsel %vm353_vm1, %v379_v9, %v381_v8 }
 0x17a   : > { %v546_v20 = vld [vmem:[#allocation2 + $0x33] sm:$0xff]  ;;  %v415_v27 = vpop.permute.xlu0 %414  ;;  %v585_v36 = vld [vmem:[#allocation2 + $0x27] sm:$0xff]  ;;  %v384_v44 = vadd.f32 %v382_v22, %v348_v34  ;;  %v618_v6 = vstv %s1478_s12  ;;  %v621_v7 = vstv %s1480_s29 }
 0x17b   : > { %v589_v21 = vadd.f32 %v584_v5, %v579_v16  ;;  %v570_v24 = vadd.f32 %v565_v18, %v560_v17  ;;  %v551_v25 = vadd.f32 %v546_v20, %v541_v19  ;;  %v603_v28 = vmul.f32 0.020408163, %v598_v15  ;;  %v556_v30 = vld [vmem:[#allocation2 + $0x34] sm:$0xff] }
 0x17c   : > { %v566_v33 = vld [vmem:[#allocation2 + $0x35] sm:$0xff]  ;;  %v418_v45 = vsel %vm389_vm2, %v415_v27, %v417_v23  ;;  %v631_v20 = vlaneseq  ;;  %v635_v27 = vstv %s825_s26 }
 0x17d   : > { %v599_v31 = vadd.f32 %v589_v21, %v507_v37  ;;  %v580_v32 = vadd.f32 %v575_v29, %v570_v24  ;;  %v561_v35 = vadd.f32 %v556_v30, %v551_v25  ;;  %v453_v39 = vpop.permute.xlu1 %452  ;;  %v605_v43 = vmul.f32 %v603_v28, %v603_v28  ;;  %v576_v42 = vld [vmem:[#allocation2 + $0x36] sm:$0xff] }
 0x17e   : > { %v451_v40 = vpop.permute.xlu0 %450  ;;  %v586_v49 = vld [vmem:[#allocation2 + $0x37] sm:$0xff]  ;;  %v420_v54 = vadd.f32 %v418_v45, %v384_v44  ;;  %v632_v23 = vshrl.u32 %v631_v20, 7 }
 0x17f   : > { %v604_v38 = vmul.f32 0.020408163, %v599_v31  ;;  %v590_v12 = vadd.f32 %v585_v36, %v580_v32  ;;  %v571_v26 = vadd.f32 %v566_v33, %v561_v35  ;;  %v454_v50 = vsel %vm425_vm3, %v451_v40, %v453_v39 }
 0x180   : > { %v456_v60 = vadd.f32 %v454_v50, %v420_v54  ;;  %v636_v30 = vadd.s32 %v635_v27, %v632_v23  ;;  %v638_v35 = vand.u32 127, %v631_v20  ;;  %v1205_v40 = vmov (!%p826_p13), 0.0  }
 0x181   : > { %v606_v46 = vmul.f32 %v604_v38, %v604_v38  ;;  %v607_v37 = vmul.f32 %v604_v38, %v603_v28  ;;  %v600_v47 = vadd.f32 %v590_v12, %v1605_v41  ;;  %v581_v48 = vadd.f32 %v576_v42, %v571_v26  ;;  %v489_v55 = vpop.permute.xlu1 %488  ;;  %649 = vst [vmem:[%s1482_s9] sm:$0xff] (!%p826_p13), %v1205_v40 }
 0x182   : > { %v487_v56 = vpop.permute.xlu0 %486  ;;  %vm639_vm6 = vcmp.ge.s32.totalorder %v636_v30, 0  ;;  %vm640_vm7 = vcmp.lt.s32.totalorder %v636_v30, 10  ;;  %vm642_vm9 = vcmp.lt.s32.totalorder %v638_v35, 10 }
 0x183   : > { %v623_v51 = vadd.f32 %v606_v46, %v605_v43  ;;  %v608_v14 = vmul.f32 0.020408163, %v600_v47  ;;  %v591_v53 = vadd.f32 %v586_v49, %v581_v48  ;;  %v490_v57 = vsel %vm461_vm4, %v487_v56, %v489_v55  ;;  %vm641_vm8 = vmand %vm639_vm6, %vm640_vm7 }
 0x184   : > { %v492_v41 = vadd.f32 %v490_v57, %v456_v60  ;;  %v617_v32 = vmul.f32 2.0, %v607_v37  ;;  %vm643_vm10 = vmand %vm641_vm8, %vm642_vm9 }
 0x185   : > { %v609_v58 = vsub.f32 %v608_v14, %v605_v43  ;;  %v601_v59 = vadd.f32 %v591_v53, %v1609_v52  ;;  %v525_v62 = vpop.permute.xlu1 %524  ;;  %v624_v9 = vadd.f32 %v623_v51, %v618_v6 }
 0x186   : > { %v523_v63 = vpop.permute.xlu0 %522  ;;  %v619_v33 = vadd.f32 %v618_v6, %v617_v32 }
 0x187   : > { %v611_v61 = vmul.f32 0.020408163, %v601_v59  ;;  %v526_v0 = vsel %vm497_vm5, %v523_v63, %v525_v62  ;;  %v610_v3 = vmul.f32 1.0208334, %v609_v58 }
 0x188   : > { %v528_v2 = vadd.f32 %v526_v0, %v492_v41 }
 0x189   : > { %v612_v1 = vsub.f32 %v611_v61, %v606_v46 }
 0x18a   : > { %537 = vst [vmem:[#allocation2 + $0x48] sm:$0xff] %v528_v2 }
 0x18b   : > { %v613_v4 = vmul.f32 1.0208334, %v612_v1 }
 0x18d   : > { %v625_v8 = vadd.f32 %v613_v4, %v610_v3 }
 0x18f   : > { %v626_v11 = vadd.f32 %v625_v8, %v621_v7 }
 0x191   : > { %v628_v13 = vmul.f32 %v626_v11, %v624_v9  ;;  %v542_v52 = vld [vmem:[#allocation2 + $0x42] sm:$0xff] }
 0x192   : > { %v547_v15 = vld [vmem:[#allocation2 + $0x43] sm:$0xff] }
 0x193   : > { %v552_v16 = vadd.f32 %v547_v15, %v542_v52  ;;  %v557_v5 = vld [vmem:[#allocation2 + $0x44] sm:$0xff]  ;;  %973 = vrcp.f32 %v628_v13 }
 0x194   : > { %v567_v18 = vld [vmem:[#allocation2 + $0x45] sm:$0xff] }
 0x195   : > { %v562_v17 = vadd.f32 %v557_v5, %v552_v16  ;;  %v577_v21 = vld [vmem:[#allocation2 + $0x46] sm:$0xff] }
 0x196   : > { %v587_v25 = vld [vmem:[#allocation2 + $0x47] sm:$0xff] }
 0x197   : > { %v572_v19 = vadd.f32 %v567_v18, %v562_v17 }
 0x199   : > { %v582_v24 = vadd.f32 %v577_v21, %v572_v19 }
 0x19b   : > { %v592_v10 = vadd.f32 %v587_v25, %v582_v24 }
 0x19d   : > { %v602_v28 = vadd.f32 %v592_v10, %v528_v2  ;;  %v974_v12 = vpop.eup %973 }
 0x19f   : > { %v614_v29 = vmul.f32 0.020408163, %v602_v28 }
 0x1a1   : > { %v615_v31 = vsub.f32 %v614_v29, %v607_v37 }
 0x1a3   : > { %v616_v22 = vmul.f32 1.0208334, %v615_v31 }
 0x1a5   : > { %v620_v36 = vmul.f32 2.0, %v616_v22 }
 0x1a7   : > { %v622_v34 = vadd.f32 %v621_v7, %v620_v36  ;;  %648 = sbr.rel (%p826_p13) target bundleno = 430 (0x1ae), region = 52 }
 0x1a9   : > { %v627_v38 = vmul.f32 %v622_v34, %v619_v33 }
 0x1ab   : > { %v630_v26 = vmul.f32 %v974_v12, %v627_v38 }
 0x1ad   : > { %v644_v39 = vsel %vm643_vm10, %v630_v26, 0.0 }
 0x1ae PF: > { %s1762_s6 = sld [smem:[#allocation20_spill]]  ;;  %s1763_s0 = sld [smem:[#allocation19_spill]]  ;;  %v650_v43 = vld [vmem:[%s1482_s9] sm:$0xff] }
 0x1af   : > { %s1765_s13 = sld [smem:[#allocation24_spill]]  ;;  %v651_v42 = vadd.f32 %v650_v43, %v644_v39  ;;  %s669_s7 = sshll.u32 %s1482_s9, 4  ;;  %s1630_s7 = int_to_ptr.vmem [resolvable:$true] %s669_s7 }
 0x1b0   : > { %s1766_s22 = sld [smem:[#allocation29_spill]]  ;;  %s654_s16 = scalar_lea.sflag [#allocation5], %s271_s30 }
 0x1b1   : > { %652 = vst [vmem:[%s1482_s9] sm:$0xff] %v651_v42  ;;  %s1048_s4 = scalar_lea.vmem %s1630_s7, 128  ;;  %s1206_s20 = smov [#allocation10]  }
 0x1b2   : > { %p1049_p0 = scmp.ne.s32.totalorder %s1630_s7, %s1048_s4  ;;  %s1052_s10 = sshll.u32 %s1206_s20, 4  ;;  %s1053_s10 = int_to_ptr.vmem [resolvable:$false] %s1052_s10 }
 0x1b3   : > { %s1054_s15 = scalar_lea.vmem %s1053_s10, 256  ;;  %p1055_p7 = scmp.lt.s32.totalorder %s1630_s7, %s1053_s10 }
 0x1b4   : > { %s828_s3 = sshll.u32 %s1762_s6, 2  ;;  %p1056_p8 = scmp.lt.s32.totalorder %s1054_s15, %s1048_s4 }
 0x1b5   : > { %s665_s18 = sadd.s32 %s1763_s0, %s828_s3  ;;  %p1768_p5 = scmp.ne.s32.totalorder %s1765_s13, 0 }
 0x1b6   : > { %s829_s8 = sshll.u32 %s665_s18, 7  ;;  %s1767_s5 = smov %s1766_s22 }
 0x1b7   : > { %s667_s11 = scalar_lea.hbm %s1766_s22, %s829_s8  ;;  %p1050_p3 = pnand %p1049_p0, %p1768_p5 }
 0x1b8   : > { %p1057_p2 = por %p1056_p8, %p1055_p7 }
 0x1b9   : > { %p1051_p6 = pneg %p1050_p3 }
 0x1bb   : > { %p1058_p1 = pnand %p1057_p2, %p1051_p6 }
 0x1bd   : > { %1061 = shalt.err (!%p1058_p1)
}
 0x1be   : > { %s1062_s9 = scalar_lea.hbm %s667_s11, 128  ;;  %s1066_s26 = scalar_lea.hbm %s1767_s5, 1024 }
 0x1bf   : > { %p1063_p10 = scmp.ne.s32.totalorder %s667_s11, %s1062_s9  ;;  %p1067_p12 = scmp.lt.u32.totalorder %s667_s11, %s1767_s5 }
 0x1c0   : > { %p1068_p11 = scmp.lt.u32.totalorder %s1066_s26, %s1062_s9  ;;  %p1070_p0 = scmp.lt.u32.totalorder %s1062_s9, %s667_s11 }
 0x1c1   : > { %p1064_p4 = pnand %p1063_p10, %p1768_p5 }
 0x1c2   : > { %p1069_p13 = por %p1068_p11, %p1067_p12 }
 0x1c3   : > { %p1065_p9 = pneg %p1064_p4 }
 0x1c4   : > { %p1071_p3 = por %p1070_p0, %p1069_p13 }
 0x1c6   : > { %p1072_p6 = pnand %p1071_p3, %p1065_p9 }
 0x1c8   : > { %1075 = shalt.err (!%p1072_p6)
}
 0x1c9   : > { %840 = dma.vmem_to_hbm [thread:$0]  (%p1768_p5), %s1630_s7, 128, %s667_s11, %s654_s16  }
 0x1ca PF: > { %s1769_s28 = sld [smem:[#allocation15_spill]]  ;;  %s1770_s3 = sld [smem:[#allocation25_spill]] }
 0x1cb   : > { %p860_p7 = scmp.ge.s32.totalorder %s1194_s24, 2 }
 0x1d0   : > { %s681_s18 = sand.u32 1, %s1769_s28   ;;  %p1771_p8 = scmp.ne.s32.totalorder %s1770_s3, 0 }
 0x1d1   : > { %s682_s8 = scalar_lea.sflag [#allocation5], %s681_s18 }
 0x1d2   : > { %p854_p2 = pnand %p860_p7, %p1771_p8 }
 0x1d4   : > { %1141 = dma.done.wait (!%p854_p2), %s682_s8, 128  }
 0x1d5   : > { %1143 = vsyncadd (!%p854_p2), %s682_s8, 4294967168  ;;  %s23_s24 = sadd.s32 1, %s1194_s24   ;;  %s1773_s13 = sld [smem:[#allocation16_spill]] }
 0x1d6   : > { %p1659_p1 = scmp.ge.s32.totalorder %s23_s24, 18   ;;  %s1774_s15 = sld [smem:[#allocation17_spill]] }
 0x1d7   : > { %s1775_s18 = sld [smem:[#allocation21_spill]]  ;;  %s1776_s7 = sld [smem:[#allocation22_spill]] }
 0x1d8   : > { %s1777_s29 = sld [smem:[#allocation26_spill]]  ;;  %s1778_s22 = sld [smem:[#allocation27_spill]] }
 0x1d9   : > { %s1783_s16 = smov %s1166_s17  ;;  %s1784_s17 = smov %s1382_s21 }
 0x1da   : > { %s1786_s20 = smov %s1190_s23  ;;  %s1788_s23 = smov %s1798_s27 }
 0x1db   : > { %s1780_s12 = smov %s1773_s13  ;;  %s1781_s13 = smov %s1154_s14 }
 0x1dc   : > { %s1782_s14 = smov %s1377_s19  ;;  %22 = sbr.rel (!%p1659_p1) target bundleno = 16 (0x10), region = 107 }
 0x1dd   : > { %s1785_s19 = smov %s1776_s7 }
 0x1de   : > { %s1787_s21 = smov %s1777_s29 }
 0x1e3   :  { %687 = vsyncpa [#allocation4], 1 }
 0x1e4   :  { %689 = vsyncpa [#allocation4 + $0x1], 1 }
 0x1e5   :  { %690 = vsyncpa [#allocation9], 1 }
 0x1e6   :  { %692 = vsyncpa [#allocation9 + $0x1], 1 }
 0x1e7   :  { %693 = vsyncpa [#allocation5], 1 }
 0x1e8   :  { %695 = vsyncpa [#allocation5 + $0x1], 1 }
 0x1e9   :  { %696 = vsyncpa [#allocation6], 1 }
 0x1ea   :  { %698 = vsyncpa [#allocation6 + $0x1], 1 }

</bundles_post_ra>
